<compile_context>
chip_gen: v5e
topology: v5e:2x2
jax: 0.10.0
libtpu: 0.0.40
codegen_flags: <defaults>
</compile_context>

<pallas_src>
import functools
import math

import numpy as np
import jax
import jax.numpy as jnp
from jax.experimental import pallas as pl
from jax.experimental.pallas import tpu as pltpu


def _round_up(x, m):
    return -(-x // m) * m


def _rgcn_kernel(blk_ref, cnt_ref, adj_ref, feat_ref, w_ref, bias_ref,
                 out_ref, ax_ref, *, tk):
    m = pl.program_id(0)          # output row tile          (parallel)
    r = pl.program_id(1)          # relation                 (reduction)
    kb = pl.program_id(2)         # nonzero column-block idx (reduction)
    n_rel = pl.num_programs(1)
    n_kb = pl.num_programs(2)

    flat = m * n_rel + r
    count = cnt_ref[flat]                       # nonzero k-blocks for (m, r)
    col0 = pl.multiple_of(blk_ref[kb, flat] * tk, tk)

    # ---- ax = sum over nonzero column blocks of A_r[m, k] @ X[k]  (MXU) ----
    @pl.when(jnp.logical_and(kb == 0, count > 0))
    def _():
        ax_ref[...] = jnp.dot(adj_ref[0], feat_ref[pl.ds(col0, tk), :],
                              preferred_element_type=jnp.float32)

    @pl.when(jnp.logical_and(kb > 0, kb < count))
    def _():
        ax_ref[...] += jnp.dot(adj_ref[0], feat_ref[pl.ds(col0, tk), :],
                               preferred_element_type=jnp.float32)

    # Relation with no edges at all in this row tile -> zero contribution.
    @pl.when(jnp.logical_and(kb == 0, count == 0))
    def _():
        ax_ref[...] = jnp.zeros_like(ax_ref)

    # ---- out (+)= ax @ W_r ; bias folded into the first relation step ----
    @pl.when(jnp.logical_and(kb == n_kb - 1, r == 0))
    def _():
        out_ref[...] = (jnp.dot(ax_ref[...].astype(w_ref.dtype), w_ref[0],
                                preferred_element_type=jnp.float32)
                        + bias_ref[...])

    @pl.when(jnp.logical_and(kb == n_kb - 1, r > 0))
    def _():
        out_ref[...] += jnp.dot(ax_ref[...].astype(w_ref.dtype), w_ref[r],
                                preferred_element_type=jnp.float32)


def prepare_rgcn_operands(adj_rnn, features, weights, bias, *, tm=None, tk=None):
    """One-time padding / casting / nonzero-block-structure extraction.

    adj_rnn:  (R, N, N) dense normalized relational adjacency (float)
    features: (N, in_dim); weights: (R, in_dim, out_dim); bias: (out_dim,)
    """
    adj_np = np.asarray(adj_rnn, dtype=np.float32)
    R, N, _ = adj_np.shape
    in_dim = int(features.shape[1])
    out_dim = int(weights.shape[2])

    if tm is None:
        # Biggest row tile that still leaves >= 2 row tiles (v7x megacore).
        tm = next((t for t in (512, 256, 128) if _round_up(N, t) // t >= 2), 128)
    if tk is None:
        tk = min(1024, _round_up(N, 128))

    nr_pad = _round_up(N, tm)
    nc_pad = _round_up(N, tk)
    in_pad = _round_up(in_dim, 128)
    out_pad = _round_up(out_dim, 128)
    n_m = nr_pad // tm
    n_kb_total = nc_pad // tk

    # Padded bf16 adjacency, built ONCE and reused across forward calls
    # (no per-call repad/recast of the big operand).
    adj_pad = np.zeros((R, nr_pad, nc_pad), np.float32)
    adj_pad[:, :N, :N] = adj_np

    # Nonzero (TM, TK) block table per (row tile, relation) for sparse skip.
    # TODO(synk): for very large graphs derive this directly from the triples
    # (never densify the adjacency); here it is extracted from the dense array.
    nz = np.any(adj_pad.reshape(R, n_m, tm, n_kb_total, tk) != 0,
                axis=(2, 4))                                  # (R, n_m, Kb)
    max_kb = max(1, int(nz.sum(axis=2).max()))
    counts = np.zeros((n_m * R,), np.int32)
    blk_ids = np.zeros((max_kb, n_m * R), np.int32)           # long axis last (SMEM)
    for mi in range(n_m):
        for ri in range(R):
            ks = np.flatnonzero(nz[ri, mi]).astype(np.int32)
            flat = mi * R + ri
            counts[flat] = ks.size
            if ks.size:
                blk_ids[:ks.size, flat] = ks
                blk_ids[ks.size:, flat] = ks[-1]   # repeat last id -> no extra DMA

    feat_pad = np.zeros((nc_pad, in_pad), np.float32)
    feat_pad[:N, :in_dim] = np.asarray(features, np.float32)
    w_pad = np.zeros((R, in_pad, out_pad), np.float32)
    w_pad[:, :in_dim, :out_dim] = np.asarray(weights, np.float32)
    b_pad = np.zeros((1, out_pad), np.float32)
    b_pad[0, :out_dim] = np.asarray(bias, np.float32)

    return dict(
        adj=jnp.asarray(adj_pad).astype(jnp.bfloat16),
        feat=jnp.asarray(feat_pad).astype(jnp.bfloat16),
        w=jnp.asarray(w_pad).astype(jnp.bfloat16),
        bias=jnp.asarray(b_pad),
        blk_ids=jnp.asarray(blk_ids),
        counts=jnp.asarray(counts),
        dims=dict(R=R, N=N, in_dim=in_dim, out_dim=out_dim, tm=tm, tk=tk,
                  nr_pad=nr_pad, nc_pad=nc_pad, in_pad=in_pad, out_pad=out_pad,
                  n_m=n_m, max_kb=max_kb),
    )


def rgcn_forward(prepared):
    """Runs the Pallas kernel on operands produced by prepare_rgcn_operands."""
    d = prepared["dims"]
    R, tm, tk = d["R"], d["tm"], d["tk"]
    nc_pad, nr_pad = d["nc_pad"], d["nr_pad"]
    in_pad, out_pad = d["in_pad"], d["out_pad"]
    n_m, max_kb = d["n_m"], d["max_kb"]
    num_rel = R  # captured by index_map lambdas

    grid = (n_m, R, max_kb)

    # Explicit VMEM budget: double-buffered blocks + resident operands + scratch.
    est = (2 * tm * tk * 2                 # adjacency stream (bf16)
           + 2 * nc_pad * in_pad * 2       # resident features (bf16)
           + 2 * R * in_pad * out_pad * 2  # resident weights (bf16)
           + 2 * 8 * out_pad * 4           # bias (f32)
           + 2 * tm * out_pad * 4          # output block (f32)
           + tm * in_pad * 4)              # ax scratch (f32)
    vmem_limit = int(min(max(2 * est, 32 * 1024 * 1024), 64 * 1024 * 1024))

    kernel = functools.partial(_rgcn_kernel, tk=tk)

    out_p = pl.pallas_call(
        kernel,
        out_shape=jax.ShapeDtypeStruct((nr_pad, out_pad), jnp.float32),
        grid_spec=pltpu.PrefetchScalarGridSpec(
            num_scalar_prefetch=2,
            grid=grid,
            in_specs=[
                # adjacency: streamed; index_map jumps straight to the kb-th
                # NONZERO column block of relation r in row tile m.
                pl.BlockSpec(
                    (1, tm, tk),
                    lambda m, r, kb, blk, cnt: (r, m, blk[kb, m * num_rel + r])),
                # features: VMEM-resident (fetched once).
                pl.BlockSpec((nc_pad, in_pad),
                             lambda m, r, kb, blk, cnt: (0, 0)),
                # per-relation weights: VMEM-resident, indexed with r in-kernel.
                pl.BlockSpec((R, in_pad, out_pad),
                             lambda m, r, kb, blk, cnt: (0, 0, 0)),
                # bias: VMEM-resident.
                pl.BlockSpec((1, out_pad),
                             lambda m, r, kb, blk, cnt: (0, 0)),
            ],
            out_specs=pl.BlockSpec((tm, out_pad),
                                   lambda m, r, kb, blk, cnt: (m, 0)),
            scratch_shapes=[pltpu.VMEM((tm, in_pad), jnp.float32)],
        ),
        compiler_params=pltpu.CompilerParams(
            dimension_semantics=("parallel", "arbitrary", "arbitrary"),
            vmem_limit_bytes=vmem_limit),
    )(prepared["blk_ids"], prepared["counts"],
      prepared["adj"], prepared["feat"], prepared["w"], prepared["bias"])

    return out_p[:d["N"], :d["out_dim"]]


def build_normalized_adj(triples, num_nodes, num_relations):
    """Host-side glue reproducing stack_matrices + sum_sparse + the
    forward/inverse sum swap for horizontal stacking (vertical_stacking=False).
    Returns dense (R, N, N) float32 adjacency."""
    # TODO(synk): sparse COO scatter / sum_sparse normalization has no clean
    # Pallas equivalent at this scale; adjacency construction stays host-side.
    triples = np.asarray(triples)
    T = triples.shape[0]
    n = num_nodes
    fr = triples[:, 0]
    rel = triples[:, 1]
    to = triples[:, 2]
    col = rel * n + to  # horizontal stacking column index

    # sum_sparse(..., row_normalisation=False): per-edge column sums
    counts = np.zeros(num_relations * n, dtype=np.float64)
    np.add.at(counts, col, 1.0)
    sums = counts[col]

    # forward() swap: forward edges use inverse-edge sums and vice versa
    gen = (T - n) // 2
    sums = np.concatenate([sums[gen:2 * gen], sums[:gen], sums[-n:]])
    vals = (1.0 / sums).astype(np.float32)

    adj = np.zeros((n, num_relations, n), dtype=np.float32)
    np.add.at(adj, (fr, rel, to), vals)  # duplicates sum, like torch sparse
    return np.ascontiguousarray(np.transpose(adj, (1, 0, 2)))  # (R, N, N)


if __name__ == "__main__":
    N = 256                # num_nodes
    R_ORIG = 2             # original relation types
    R = 2 * R_ORIG + 1     # + inverse relations + self-loop relation
    IN = 16                # in_features
    OUT = 32               # out_features
    E = 64                 # general (forward) edge count

    key = jax.random.PRNGKey(0)
    k_src, k_dst, k_rel, k_feat, k_w, k_b = jax.random.split(key, 6)
    src = jax.random.randint(k_src, (E,), 0, N, dtype=jnp.int32)
    dst = jax.random.randint(k_dst, (E,), 0, N, dtype=jnp.int32)
    rel = jax.random.randint(k_rel, (E,), 0, R_ORIG, dtype=jnp.int32)

    fwd = jnp.stack([src, rel, dst], axis=1)
    inv = jnp.stack([dst, rel + R_ORIG, src], axis=1)
    nodes = jnp.arange(N, dtype=jnp.int32)
    slf = jnp.stack(
        [nodes, jnp.full((N,), 2 * R_ORIG, dtype=jnp.int32), nodes], axis=1)
    triples = jnp.concatenate([fwd, inv, slf], axis=0)  # (2E + N, 3)

    features = jax.random.normal(k_feat, (N, IN), dtype=jnp.float32)

    # glorot_uniform with relu gain (matches reset_parameters on (R, in, out))
    gain = math.sqrt(2.0)
    fan_in, fan_out = IN * OUT, R * OUT
    bound = gain * math.sqrt(6.0 / (fan_in + fan_out))
    weights = jax.random.uniform(
        k_w, (R, IN, OUT), dtype=jnp.float32, minval=-bound, maxval=bound)
    # glorot init zeroes the bias; use a small nonzero bias here to exercise
    # the bias-add path of forward().
    bias = 0.1 * jax.random.normal(k_b, (OUT,), dtype=jnp.float32)

    adj = build_normalized_adj(triples, N, R)  # (R, N, N) numpy f32

    # Small explicit tiles at this toy size so the demo exercises multiple row
    # tiles, multiple k-blocks, and the sparse-skip / padded-step paths; the
    # auto-chosen production defaults (tm up to 512, tk up to 1024) are larger.
    prepared = prepare_rgcn_operands(adj, features, weights, bias, tm=128, tk=128)
    out = jax.block_until_ready(rgcn_forward(prepared))

    # Plain-numpy f32 reference of the same forward math.
    fw_ref = np.einsum('ni,rio->rno', np.asarray(features), np.asarray(weights))
    ref = np.einsum('rnm,rmo->no', np.asarray(adj), fw_ref) + np.asarray(bias)
    assert out.shape == (N, OUT)
    # bf16 streaming operands -> slightly looser tolerance than pure f32.
    assert np.allclose(np.asarray(out), ref, rtol=2e-2, atol=2e-2), \
        "kernel/reference mismatch"

    print("KERNEL_OK")
</pallas_src>

<mosaic_0001>
module attributes {stable_mosaic.version = 11 : i64} {
  func.func @_rgcn_kernel(%arg0: i32, %arg1: i32, %arg2: i32, %arg3: memref<2x10xi32, #tpu.memory_space<smem>>, %arg4: memref<10xi32, #tpu.memory_space<smem>>, %arg5: memref<1x128x128xbf16, #tpu.memory_space<vmem>>, %arg6: memref<256x128xbf16, #tpu.memory_space<vmem>>, %arg7: memref<5x128x128xbf16, #tpu.memory_space<vmem>>, %arg8: memref<1x128xf32, #tpu.memory_space<vmem>>, %arg9: memref<128x128xf32, #tpu.memory_space<vmem>>, %arg10: memref<128x128xf32, #tpu.memory_space<vmem>>) attributes {dimension_semantics = [#tpu.dimension_semantics<parallel>, #tpu.dimension_semantics<arbitrary>, #tpu.dimension_semantics<arbitrary>], iteration_bounds = array<i64: 2, 5, 2>, scalar_prefetch = 2 : i64, scratch_operands = 1 : i64, tpu.core_type = #tpu.core_type<tc>, window_params = [{transform_indices = @transform_0, window_bounds = array<i64: 1, 128, 128>}, {pipeline_mode = #tpu.pipeline_mode<synchronous>, transform_indices = @transform_1, window_bounds = array<i64: 256, 128>}, {pipeline_mode = #tpu.pipeline_mode<synchronous>, transform_indices = @transform_2, window_bounds = array<i64: 5, 128, 128>}, {pipeline_mode = #tpu.pipeline_mode<synchronous>, transform_indices = @transform_3, window_bounds = array<i64: 1, 128>}, {transform_indices = @transform_4, window_bounds = array<i64: 128, 128>}]} {
    %c5_i32 = arith.constant 5 : i32
    %0 = arith.muli %arg0, %c5_i32 : i32
    %1 = arith.addi %0, %arg1 : i32
    %2 = arith.index_cast %1 : i32 to index
    %3 = memref.load %arg4[%2] : memref<10xi32, #tpu.memory_space<smem>>
    %4 = arith.index_cast %arg2 : i32 to index
    %5 = arith.index_cast %1 : i32 to index
    %6 = memref.load %arg3[%4, %5] : memref<2x10xi32, #tpu.memory_space<smem>>
    %c128_i32 = arith.constant 128 : i32
    %7 = arith.muli %6, %c128_i32 : i32
    %8 = tpu.assume_multiple %7, 128 : i32
    %c0_i32 = arith.constant 0 : i32
    %9 = arith.cmpi eq, %arg2, %c0_i32 : i32
    %c0_i32_0 = arith.constant 0 : i32
    %10 = arith.cmpi sgt, %3, %c0_i32_0 : i32
    %11 = arith.andi %9, %10 : i1
    %12 = arith.extui %11 : i1 to i32
    %c0_i32_1 = arith.constant 0 : i32
    %13 = arith.cmpi ne, %12, %c0_i32_1 : i32
    scf.if %13 {
      %c0 = arith.constant 0 : index
      %c0_12 = arith.constant 0 : index
      %c0_13 = arith.constant 0 : index
      %34 = vector.load %arg5[%c0, %c0_12, %c0_13] : memref<1x128x128xbf16, #tpu.memory_space<vmem>>, vector<1x128x128xbf16>
      %35 = vector.shape_cast %34 : vector<1x128x128xbf16> to vector<128x128xbf16>
      %36 = arith.index_cast %8 : i32 to index
      %c0_14 = arith.constant 0 : index
      %37 = vector.load %arg6[%36, %c0_14] : memref<256x128xbf16, #tpu.memory_space<vmem>>, vector<128x128xbf16>
      %cst = arith.constant dense<0.000000e+00> : vector<128x128xf32>
      %38 = tpu.matmul %35, %37, %cst {dimension_numbers = #tpu.dot_dimension_numbers<[1], [0], [0], [1], [0, 0, 1, 1], [], []>} : vector<128x128xbf16>, vector<128x128xbf16>, vector<128x128xf32> -> vector<128x128xf32>
      %c0_15 = arith.constant 0 : index
      %c0_16 = arith.constant 0 : index
      %39 = vector.load %arg10[%c0_15, %c0_16] : memref<128x128xf32, #tpu.memory_space<vmem>>, vector<128x128xf32>
      tpu.vector_store %arg10[%c0_15, %c0_16], %38 {strides = array<i32>} : memref<128x128xf32, #tpu.memory_space<vmem>>, vector<128x128xf32>,
    } else {
    }
    %c0_i32_2 = arith.constant 0 : i32
    %14 = arith.cmpi sgt, %arg2, %c0_i32_2 : i32
    %15 = arith.cmpi slt, %arg2, %3 : i32
    %16 = arith.andi %14, %15 : i1
    %17 = arith.extui %16 : i1 to i32
    %c0_i32_3 = arith.constant 0 : i32
    %18 = arith.cmpi ne, %17, %c0_i32_3 : i32
    scf.if %18 {
      %c0 = arith.constant 0 : index
      %c0_12 = arith.constant 0 : index
      %34 = vector.load %arg10[%c0, %c0_12] : memref<128x128xf32, #tpu.memory_space<vmem>>, vector<128x128xf32>
      %c0_13 = arith.constant 0 : index
      %c0_14 = arith.constant 0 : index
      %c0_15 = arith.constant 0 : index
      %35 = vector.load %arg5[%c0_13, %c0_14, %c0_15] : memref<1x128x128xbf16, #tpu.memory_space<vmem>>, vector<1x128x128xbf16>
      %36 = vector.shape_cast %35 : vector<1x128x128xbf16> to vector<128x128xbf16>
      %37 = arith.index_cast %8 : i32 to index
      %c0_16 = arith.constant 0 : index
      %38 = vector.load %arg6[%37, %c0_16] : memref<256x128xbf16, #tpu.memory_space<vmem>>, vector<128x128xbf16>
      %cst = arith.constant dense<0.000000e+00> : vector<128x128xf32>
      %39 = tpu.matmul %36, %38, %cst {dimension_numbers = #tpu.dot_dimension_numbers<[1], [0], [0], [1], [0, 0, 1, 1], [], []>} : vector<128x128xbf16>, vector<128x128xbf16>, vector<128x128xf32> -> vector<128x128xf32>
      %40 = arith.addf %34, %39 : vector<128x128xf32>
      %c0_17 = arith.constant 0 : index
      %c0_18 = arith.constant 0 : index
      %41 = vector.load %arg10[%c0_17, %c0_18] : memref<128x128xf32, #tpu.memory_space<vmem>>, vector<128x128xf32>
      tpu.vector_store %arg10[%c0_17, %c0_18], %40 {strides = array<i32>} : memref<128x128xf32, #tpu.memory_space<vmem>>, vector<128x128xf32>,
    } else {
    }
    %c0_i32_4 = arith.constant 0 : i32
    %19 = arith.cmpi eq, %arg2, %c0_i32_4 : i32
    %c0_i32_5 = arith.constant 0 : i32
    %20 = arith.cmpi eq, %3, %c0_i32_5 : i32
    %21 = arith.andi %19, %20 : i1
    %22 = arith.extui %21 : i1 to i32
    %c0_i32_6 = arith.constant 0 : i32
    %23 = arith.cmpi ne, %22, %c0_i32_6 : i32
    scf.if %23 {
      %cst = arith.constant 0.000000e+00 : f32
      %34 = vector.broadcast %cst : f32 to vector<128x128xf32>
      %c0 = arith.constant 0 : index
      %c0_12 = arith.constant 0 : index
      %35 = vector.load %arg10[%c0, %c0_12] : memref<128x128xf32, #tpu.memory_space<vmem>>, vector<128x128xf32>
      tpu.vector_store %arg10[%c0, %c0_12], %34 {strides = array<i32>} : memref<128x128xf32, #tpu.memory_space<vmem>>, vector<128x128xf32>,
    } else {
    }
    %c1_i32 = arith.constant 1 : i32
    %24 = arith.cmpi eq, %arg2, %c1_i32 : i32
    %c0_i32_7 = arith.constant 0 : i32
    %25 = arith.cmpi eq, %arg1, %c0_i32_7 : i32
    %26 = arith.andi %24, %25 : i1
    %27 = arith.extui %26 : i1 to i32
    %c0_i32_8 = arith.constant 0 : i32
    %28 = arith.cmpi ne, %27, %c0_i32_8 : i32
    scf.if %28 {
      %c0 = arith.constant 0 : index
      %c0_12 = arith.constant 0 : index
      %34 = vector.load %arg10[%c0, %c0_12] : memref<128x128xf32, #tpu.memory_space<vmem>>, vector<128x128xf32>
      %35 = arith.truncf %34 : vector<128x128xf32> to vector<128x128xbf16>
      %c0_13 = arith.constant 0 : index
      %c0_14 = arith.constant 0 : index
      %c0_15 = arith.constant 0 : index
      %36 = vector.load %arg7[%c0_13, %c0_14, %c0_15] : memref<5x128x128xbf16, #tpu.memory_space<vmem>>, vector<1x128x128xbf16>
      %37 = vector.shape_cast %36 : vector<1x128x128xbf16> to vector<128x128xbf16>
      %cst = arith.constant dense<0.000000e+00> : vector<128x128xf32>
      %38 = tpu.matmul %35, %37, %cst {dimension_numbers = #tpu.dot_dimension_numbers<[1], [0], [0], [1], [0, 0, 1, 1], [], []>} : vector<128x128xbf16>, vector<128x128xbf16>, vector<128x128xf32> -> vector<128x128xf32>
      %c0_16 = arith.constant 0 : index
      %c0_17 = arith.constant 0 : index
      %39 = vector.load %arg8[%c0_16, %c0_17] : memref<1x128xf32, #tpu.memory_space<vmem>>, vector<1x128xf32>
      %40 = vector.broadcast %39 : vector<1x128xf32> to vector<128x128xf32>
      %41 = arith.addf %38, %40 : vector<128x128xf32>
      %c0_18 = arith.constant 0 : index
      %c0_19 = arith.constant 0 : index
      %42 = vector.load %arg9[%c0_18, %c0_19] : memref<128x128xf32, #tpu.memory_space<vmem>>, vector<128x128xf32>
      tpu.vector_store %arg9[%c0_18, %c0_19], %41 {strides = array<i32>} : memref<128x128xf32, #tpu.memory_space<vmem>>, vector<128x128xf32>,
    } else {
    }
    %c1_i32_9 = arith.constant 1 : i32
    %29 = arith.cmpi eq, %arg2, %c1_i32_9 : i32
    %c0_i32_10 = arith.constant 0 : i32
    %30 = arith.cmpi sgt, %arg1, %c0_i32_10 : i32
    %31 = arith.andi %29, %30 : i1
    %32 = arith.extui %31 : i1 to i32
    %c0_i32_11 = arith.constant 0 : i32
    %33 = arith.cmpi ne, %32, %c0_i32_11 : i32
    scf.if %33 {
      %c0 = arith.constant 0 : index
      %c0_12 = arith.constant 0 : index
      %34 = vector.load %arg9[%c0, %c0_12] : memref<128x128xf32, #tpu.memory_space<vmem>>, vector<128x128xf32>
      %c0_13 = arith.constant 0 : index
      %c0_14 = arith.constant 0 : index
      %35 = vector.load %arg10[%c0_13, %c0_14] : memref<128x128xf32, #tpu.memory_space<vmem>>, vector<128x128xf32>
      %36 = arith.truncf %35 : vector<128x128xf32> to vector<128x128xbf16>
      %37 = arith.index_cast %arg1 : i32 to index
      %c0_15 = arith.constant 0 : index
      %c0_16 = arith.constant 0 : index
      %38 = vector.load %arg7[%37, %c0_15, %c0_16] : memref<5x128x128xbf16, #tpu.memory_space<vmem>>, vector<1x128x128xbf16>
      %39 = vector.shape_cast %38 : vector<1x128x128xbf16> to vector<128x128xbf16>
      %cst = arith.constant dense<0.000000e+00> : vector<128x128xf32>
      %40 = tpu.matmul %36, %39, %cst {dimension_numbers = #tpu.dot_dimension_numbers<[1], [0], [0], [1], [0, 0, 1, 1], [], []>} : vector<128x128xbf16>, vector<128x128xbf16>, vector<128x128xf32> -> vector<128x128xf32>
      %41 = arith.addf %34, %40 : vector<128x128xf32>
      %c0_17 = arith.constant 0 : index
      %c0_18 = arith.constant 0 : index
      %42 = vector.load %arg9[%c0_17, %c0_18] : memref<128x128xf32, #tpu.memory_space<vmem>>, vector<128x128xf32>
      tpu.vector_store %arg9[%c0_17, %c0_18], %41 {strides = array<i32>} : memref<128x128xf32, #tpu.memory_space<vmem>>, vector<128x128xf32>,
    } else {
    }
    return
  }
  func.func @transform_0(%arg0: i32, %arg1: i32, %arg2: i32, %arg3: memref<2x10xi32, #tpu.memory_space<smem>>, %arg4: memref<10xi32, #tpu.memory_space<smem>>) -> (i32, i32, i32) {
    %c5_i32 = arith.constant 5 : i32
    %0 = arith.muli %arg0, %c5_i32 : i32
    %1 = arith.addi %0, %arg1 : i32
    %2 = arith.index_cast %arg2 : i32 to index
    %3 = arith.index_cast %1 : i32 to index
    %4 = memref.load %arg3[%2, %3] : memref<2x10xi32, #tpu.memory_space<smem>>
    %c0_i32 = arith.constant 0 : i32
    return %arg1, %arg0, %4 : i32, i32, i32
  }
  func.func @transform_1(%arg0: i32, %arg1: i32, %arg2: i32, %arg3: memref<2x10xi32, #tpu.memory_space<smem>>, %arg4: memref<10xi32, #tpu.memory_space<smem>>) -> (i32, i32) {
    %c0_i32 = arith.constant 0 : i32
    %c0_i32_0 = arith.constant 0 : i32
    %c0_i32_1 = arith.constant 0 : i32
    return %c0_i32, %c0_i32_0 : i32, i32
  }
  func.func @transform_2(%arg0: i32, %arg1: i32, %arg2: i32, %arg3: memref<2x10xi32, #tpu.memory_space<smem>>, %arg4: memref<10xi32, #tpu.memory_space<smem>>) -> (i32, i32, i32) {
    %c0_i32 = arith.constant 0 : i32
    %c0_i32_0 = arith.constant 0 : i32
    %c0_i32_1 = arith.constant 0 : i32
    %c0_i32_2 = arith.constant 0 : i32
    return %c0_i32, %c0_i32_0, %c0_i32_1 : i32, i32, i32
  }
  func.func @transform_3(%arg0: i32, %arg1: i32, %arg2: i32, %arg3: memref<2x10xi32, #tpu.memory_space<smem>>, %arg4: memref<10xi32, #tpu.memory_space<smem>>) -> (i32, i32) {
    %c0_i32 = arith.constant 0 : i32
    %c0_i32_0 = arith.constant 0 : i32
    %c0_i32_1 = arith.constant 0 : i32
    return %c0_i32, %c0_i32_0 : i32, i32
  }
  func.func @transform_4(%arg0: i32, %arg1: i32, %arg2: i32, %arg3: memref<2x10xi32, #tpu.memory_space<smem>>, %arg4: memref<10xi32, #tpu.memory_space<smem>>) -> (i32, i32) {
    %c0_i32 = arith.constant 0 : i32
    %c0_i32_0 = arith.constant 0 : i32
    return %arg0, %c0_i32 : i32, i32
  }
}

</mosaic_0001>

<bundles_post_ra>
// kernel: tpu_custom_call.1
= control target key start
LH: loop header
LB: loop body
LE: loop exit
PB: predicated region body
PF: predicated region fallthrough
CT: control target
= control target key end

     0   :  { %s2078_s27 = smov [#allocation4]   ;;  %s2079_s28 = smov [#allocation5]   ;;  %s2527_s0 = inlined_call_operand.hbm [shape: s32[2,10], index: 0, kind: input, shape index: {}]   ;;  %s2528_s2 = inlined_call_operand.hbm [shape: bf16[5,256,256], index: 2, kind: input, shape index: {}]   ;;  %s2529_s3 = inlined_call_operand.hbm [shape: bf16[256,128], index: 3, kind: input, shape index: {}]   ;;  %s2530_s4 = inlined_call_operand.hbm [shape: bf16[5,128,128], index: 4, kind: input, shape index: {}]   ;;  %s2531_s5 = inlined_call_operand.vmem [shape: f32[1,128], index: 5, kind: input, shape index: {}]   ;;  %s2532_s6 = inlined_call_operand.hbm [shape: f32[256,128], index: 6, kind: output, shape index: {}]   ;;  %s2533_s1 = inlined_call_operand.hbm [shape: s32[10], index: 1, kind: input, shape index: {}]  }
   0x1   :  { %2550 = sst [smem:[#allocation29_spill]] %s2529_s3  ;;  %s12_s23 = sshll.u32 %s2527_s0, 4  ;;  %s13_s23 = int_to_ptr.hbm [resolvable:$true] %s12_s23 }
   0x2   :  { %2551 = sst [smem:[#allocation30_spill]] %s2530_s4  ;;  %s17_s26 = sshll.u32 %s2533_s1, 4  ;;  %s18_s26 = int_to_ptr.hbm [resolvable:$true] %s17_s26 }
   0x3   :  { %2552 = sst [smem:[#allocation31_spill]] %s2531_s5 }
   0x4   :  { %2553 = sst [smem:[#allocation32_spill]] %s2532_s6 }
   0x5   :  { %15 = dma.hbm_to_smem %s13_s23, 32, %s2078_s27, [#allocation3] }
   0x6   :  { %20 = dma.hbm_to_smem %s18_s26, 16, %s2079_s28, [#allocation3] }
   0x7   :  { %2012 = dma.done.wait [#allocation3], 48 }
   0x8   :  { %2013 = vsyncadd [#allocation3], 4294967248 }
   0x9   :  { %23 = sfence }
   0xa   :  { %24 = vsyncpa [#allocation7], 0 }
   0xb   :  { %26 = vsyncpa [#allocation7 + $0x1], 0 }
   0xc   :  { %27 = vsyncpa [#allocation10], 0 }
   0xd   :  { %28 = vsyncpa [#allocation8], 0 }
   0xe   :  { %30 = vsyncpa [#allocation8 + $0x1], 0  ;;  %s2129_s29 = smov 0   ;;  %s2131_s0 = smov 0  }
   0xf   :  { %s2133_s30 = smov 0   ;;  %s2135_s1 = smov 0  }
  0x10   :  { %s2137_s7 = smov 0   ;;  %s2139_s8 = smov 0  }
  0x11   :  { %s2141_s9 = smov 0   ;;  %s2143_s10 = smov 0  }
  0x12   :  { %s2145_s11 = smov 0   ;;  %s2147_s12 = smov 0  }
  0x13   :  { %s2149_s13 = smov 0   ;;  %s2151_s14 = smov 0  }
  0x14   :  { %s2153_s15 = smov 0  }
  0x15 LB: > { %2554 = sst [smem:[#allocation19_spill]] %s2028_s29  ;;  %s1297_s16 = sadd.s32 4294967295, %s2076_s15   ;;  %s2076_s15 = sphi %s2153_s15, %s36_s15   ;;  %s2072_s14 = sphi %s2151_s14, %s2598_s14   ;;  %s2068_s13 = sphi %s2149_s13, %s2606_s13   ;;  %s2064_s12 = sphi %s2147_s12, %s2596_s12   ;;  %s2060_s11 = sphi %s2145_s11, %s2595_s11   ;;  %s2056_s10 = sphi %s2143_s10, %s2605_s10   ;;  %s2052_s9 = sphi %s2141_s9, %s2594_s9   ;;  %s2048_s8 = sphi %s2139_s8, %s2604_s8   ;;  %s2044_s7 = sphi %s2137_s7, %s2603_s7   ;;  %s2040_s1 = sphi %s2135_s1, %s2602_s1   ;;  %s2036_s30 = sphi %s2133_s30, %s2601_s30   ;;  %s2032_s0 = sphi %s2131_s0, %s2600_s0   ;;  %s2028_s29 = sphi %s2129_s29, %s2599_s29  }
  0x16   : > { %2555 = sst [smem:[#allocation20_spill]] %s2052_s9  ;;  %s1298_s17 = sadd.s32 4294967294, %s2076_s15  }
  0x17   : > { %2556 = sst [smem:[#allocation21_spill]] %s2056_s10  ;;  %p99_p0 = scmp.ne.s32.totalorder %s2044_s7, %s2040_s1 }
  0x18   : > { %2557 = sst [smem:[#allocation22_spill]] %s2064_s12  ;;  %p2195_p1 = scmp.eq.s32.totalorder %s1297_s16, 0 }
  0x19   : > { %2558 = sst [smem:[#allocation23_spill]] %s2072_s14  ;;  %p185_p2 = scmp.ne.s32.totalorder %s2036_s30, %s2032_s0 }
  0x1a   : > { %p2203_p3 = por %p2195_p1, %p99_p0  ;;  %p186_p4 = scmp.eq.s32.totalorder %s1297_s16, 19 }
  0x1b   : > { %p191_p5 = scmp.ne.s32.totalorder %s2032_s0, %s2028_s29  ;;  %p192_p6 = scmp.eq.s32.totalorder %s1298_s17, 19 }
  0x1c   : > { %p2209_p7 = por %p186_p4, %p185_p2  ;;  %p1301_p8 = scmp.ge.s32.totalorder %s2076_s15, 1 }
  0x1d   : > { %p2214_p9 = por %p192_p6, %p191_p5  ;;  %p199_p10 = scmp.lt.s32.totalorder %s2076_s15, 21 }
  0x1e   : > { %s2561_s20 = scalar_select %p2209_p7, 1, 0 }
  0x1f   : > { %s2563_s21 = scalar_select %p2214_p9, 1, 0 }
  0x20   : > { %2562 = sst [smem:[#allocation24_spill]] %s2561_s20  ;;  %p2222_p11 = pnand %p1301_p8, %p199_p10 }
  0x21   : > { %2564 = sst [smem:[#allocation25_spill]] %s2563_s21  ;;  %s2080_s26 = smov [#allocation9]  }
  0x22   : > { %s2565_s3 = sld [smem:[#allocation29_spill]]  ;;  %p1680_p12 = pneg %p2222_p11 }
  0x23   : > { %s212_s27 = sshll.u32 %s2080_s26, 4  ;;  %s2567_s4 = sld [smem:[#allocation30_spill]]  ;;  %s213_s27 = int_to_ptr.vmem [resolvable:$true] %s212_s27 }
  0x24   : > { %p1681_p13 = pnand %p1680_p12, %p2195_p1  ;;  %s2536_s17 = smov 64  }
  0x25   : > { %s2537_s22 = smov 4   ;;  %s2083_s23 = smov [#allocation11]  }
  0x26   : > { %s226_s26 = sshll.u32 %s2083_s23, 4  ;;  %s48_s28 = sadd.s32 1, %s2064_s12  ;;  %s227_s26 = int_to_ptr.vmem [resolvable:$true] %s226_s26 }
  0x27   : > { %p49_p0 = scmp.ge.s32.totalorder %s48_s28, 2  ;;  %s51_s1 = sadd.s32 1, %s2068_s13 }
  0x28   : > { %s210_s24 = sshll.u32 %s2565_s3, 4  ;;  %s59_s3 = smul.u32 5, %s2072_s14  ;;  %s211_s24 = int_to_ptr.hbm [resolvable:$true] %s210_s24 }
  0x29   : > { %s224_s16 = sshll.u32 %s2567_s4, 4  ;;  %s2608_s1 = smov (!%p49_p0, %s51_s1), %s2068_s13  ;;  %s225_s16 = int_to_ptr.hbm [resolvable:$true] %s224_s16 }
  0x2a   : > { %1683 = dma.hbm_to_vmem [thread:$0]  (!%p1681_p13), %s211_s24, 2048, %s213_s27, [#allocation10], %s2536_s17, %s2536_s17, %s2537_s22  }
  0x2b   : > { %1686 = dma.hbm_to_vmem [thread:$0]  (!%p1681_p13), %s225_s16, 5120, %s227_s26, [#allocation10], %s2536_s17, %s2536_s17, %s2537_s22  }
  0x2c   : > { %s55_s24 = sadd.s32 1, %s2072_s14  ;;  %s60_s27 = sadd.s32 %s2068_s13, %s59_s3 }
  0x2d   : > { %p53_p2 = scmp.ge.s32.totalorder %s2608_s1, 5  ;;  %s61_s23 = sshra.s32 %s60_s27, 7 }
  0x2e   : > { %s2610_s28 = smov (%p49_p0, %s48_s28), 0  ;;  %s63_s21 = sadd.s32 %s2064_s12, %s61_s23 }
  0x2f   : > { %2568 = sst [smem:[#allocation26_spill]] %s2610_s28  ;;  %s66_s29 = sand.u32 127, %s60_s27 }
  0x30   : > { %s2612_s24 = smov (!%p53_p2, %s55_s24), %s2072_s14  ;;  %s2614_s1 = smov (%p53_p2, %s2608_s1), 0 }
  0x31   : > { %2569 = sst [smem:[#allocation27_spill]] %s2614_s1  ;;  %p57_p4 = scmp.ge.s32.totalorder %s2612_s24, 2 }
  0x32   : > { %s1299_s16 = sshll.u32 %s63_s21, 7  ;;  %p93_p5 = scmp.ne.s32.totalorder %s2048_s8, %s2044_s7 }
  0x33   : > { %p94_p6 = scmp.eq.s32.totalorder %s2076_s15, 0  ;;  %s2616_s24 = smov (%p57_p4, %s2612_s24), 0 }
  0x34   : > { %2570 = sst [smem:[#allocation28_spill]] %s2616_s24  ;;  %s67_s3 = sadd.s32 %s1299_s16, %s66_s29 }
  0x35   : > { %s79_s26 = ssub.s32 %s2068_s13, %s2614_s1  ;;  %s68_s27 = sld [smem:[#allocation4 + %s67_s3]] }
  0x36   : > { %s69_s23 = smul.u32 5, %s2616_s24  ;;  %s80_s17 = ssub.s32 %s2072_s14, %s2616_s24 }
  0x37   : > { %p2262_p8 = por %p94_p6, %p93_p5  ;;  %p173_p10 = scmp.eq.s32.totalorder %s80_s17, 0 }
  0x38   : > { %s70_s21 = sadd.s32 %s69_s23, %s2614_s1  ;;  %s2547_s12 = sand.u32 1, %s2048_s8  }
  0x39   : > { %s71_s4 = sshra.s32 %s70_s21, 7  ;;  %s76_s29 = sand.u32 127, %s70_s21 }
  0x3a   : > { %s73_s16 = sadd.s32 %s71_s4, %s2610_s28  ;;  %p1699_p12 = scmp.lt.s32.totalorder %s2076_s15, 20 }
  0x3b   : > { %s1300_s6 = sshll.u32 %s73_s16, 7  ;;  %s81_s20 = sor.u32 %s80_s17, %s79_s26 }
  0x3c   : > { %s77_s24 = sadd.s32 %s1300_s6, %s76_s29  ;;  %s1305_s9 = sshll.u32 %s2547_s12, 6 }
  0x3d   : > { %s78_s5 = sld [smem:[#allocation4 + %s77_s24]]  ;;  %s2572_s23 = sadd.s32 1, %s2036_s30 }
  0x3e   : > { %s2275_s1 = scalar_select %p173_p10, %s2036_s30, %s2572_s23  }
  0x3f   : > { %s1670_s10 = scalar_select %p2262_p8, [#allocation4], [#allocation13] }
  0x40   : > { %s2618_s3 = smov (!%p2262_p8, %s67_s3), 0  ;;  %s86_s21 = sadd.s32 1, %s2048_s8 }
  0x41   : > { %s2620_s10 = smov (!%p1699_p12, %s1670_s10), [#allocation14]  ;;  %s2622_s3 = smov (!%p1699_p12, %s2618_s3), 0 }
  0x42   : > { %s257_s17 = sld [smem:[%s2620_s10 + %s2622_s3]]  ;;  %s1519_s24 = sshll.u32 %s2072_s14, 5 }
  0x43   : > { %s82_s4 = ssub.s32 %s68_s27, %s78_s5  ;;  %p2291_p0 = pnand %p1699_p12, %p2262_p8 }
  0x44   : > { %s83_s6 = sor.u32 %s82_s4, %s81_s20  ;;  %s1309_s16 = sshll.u32 %s2068_s13, 6 }
  0x45   : > { %p84_p13 = scmp.eq.s32.totalorder %s83_s6, 0  ;;  %s247_s23 = scalar_lea.vmem [#allocation6], %s1305_s9 }
  0x46   : > { %s269_s12 = sshll.u32 %s247_s23, 4  ;;  %s2574_s4 = sand.u32 1, %s2048_s8   ;;  %s270_s12 = int_to_ptr.vmem [resolvable:$true] %s269_s12 }
  0x47   : > { %s2296_s29 = scalar_select %p84_p13, %s2048_s8, %s86_s21  }
  0x48   : > { %s262_s28 = sadd.s32 %s1519_s24, %s257_s17  ;;  %s244_s6 = scalar_lea.sflag [#allocation7], %s2574_s4 }
  0x49   : > { %s264_s5 = sadd.s32 %s1309_s16, %s262_s28  ;;  %p1906_p4 = pneg %p2291_p0 }
  0x4a   : > { %s1310_s27 = sshll.u32 %s264_s5, 2  ;;  %s1909_s17 = scalar_lea.hbm %s2528_s2, 1280 }
  0x4b   : > { %s266_s3 = scalar_lea.hbm %s2528_s2, %s1310_s27 }
  0x4c   : > { %s267_s22 = sshll.u32 %s266_s3, 4  ;;  %s268_s22 = int_to_ptr.hbm [resolvable:$true] %s267_s22 }
  0x4d   : > { %s1902_s14 = sshra.s32 %s268_s22, 4  ;;  %s1903_s14 = int_to_ptr.hbm [resolvable:$true] %s1902_s14 }
  0x4e   : > { %s1904_s21 = scalar_lea.hbm %s1903_s14, 64  ;;  %p1910_p8 = scmp.lt.s32.totalorder %s1903_s14, %s2528_s2 }
  0x4f   : > { %p1905_p2 = scmp.ne.s32.totalorder %s1903_s14, %s1904_s21  ;;  %p1911_p10 = scmp.lt.s32.totalorder %s1909_s17, %s1904_s21 }
  0x51   : > { %p1907_p5 = pnand %p1906_p4, %p1905_p2  ;;  %p1912_p12 = por %p1911_p10, %p1910_p8 }
  0x53   : > { %p1908_p6 = pneg %p1907_p5 }
  0x55   : > { %p1913_p13 = pnand %p1912_p12, %p1908_p6 }
  0x57   : > { %1916 = shalt.err (!%p1913_p13)
}
  0x58   : > { %s2084_s23 = smov 128   ;;  %s2575_s5 = smov 4  }
  0x59   : > { %s2576_s27 = smov 64   ;;  %281 = sbr.rel (%p2222_p11) target bundleno = 984 (0x3d8), region = 36 }
  0x5a   : > { %1692 = dma.hbm_to_vmem [thread:$0]  (!%p2291_p0), %s268_s22, 1024, %s270_s12, %s244_s6, %s2084_s23, %s2576_s27, %s2575_s5  }
  0x5b   : > { %s283_s20 = sand.u32 (!%p2222_p11), 1, %s2044_s7  }
  0x5c   : > { %s1312_s10 = sshll.u32 (!%p2222_p11), %s283_s20, 6  ;;  %s284_s3 = scalar_lea.sflag (!%p2222_p11), [#allocation7], %s283_s20 }
  0x5d   : > { %s2319_s4 = scalar_lea.vmem (!%p2222_p11), [#allocation6], %s1312_s10 }
  0x5e   : > { %2015 = dma.done.wait (%p2203_p3), %s284_s3, 1024  }
  0x5f   : > { %2017 = vsyncadd (%p2203_p3), %s284_s3, 4294966272 }
  0x60   : > { %2019 = dma.done.wait (%p2195_p1), [#allocation10], 7168  }
  0x61   : > { %2021 = vsyncadd (%p2195_p1), [#allocation10], 4294960128  ;;  %s2577_s12 = sld [smem:[#allocation21_spill]]  ;;  %s335_s25 = smul.u32 5, %s2060_s11 }
  0x62   : > { %s2578_s14 = sld [smem:[#allocation20_spill]]  ;;  %s320_s26 = sand.u32 1, %s2032_s0  }
  0x63   : > { %s1315_s6 = sshll.u32 %s320_s26, 7 }
  0x64   : > { %s2344_s23 = scalar_lea.vmem [#allocation12], %s1315_s6 }
  0x67   : > { %s336_s22 = sadd.s32 %s2577_s12, %s335_s25 }
  0x68   : > { %s2334_s19 = sld [smem:[#allocation5 + %s336_s22]]  ;;  %s338_s21 = sshra.s32 %s336_s22, 7 }
  0x69   : > { %s340_s9 = sadd.s32 %s2578_s14, %s338_s21  ;;  %s343_s28 = sand.u32 127, %s336_s22 }
  0x6a   : > { %s1316_s18 = sshll.u32 %s340_s9, 7  ;;  %p347_p1 = scmp.eq.s32.totalorder %s2578_s14, 0 }
  0x6b   : > { %s344_s17 = sadd.s32 %s1316_s18, %s343_s28 }
  0x6c   : > { %s2337_s24 = sld [smem:[#allocation4 + %s344_s17]] }
  0x6e   : > { %p348_p3 = scmp.gt.s32.totalorder %s2334_s19, 0 }
  0x70   : > { %p349_p11 = pnand %p348_p3, %p347_p1 }
  0x72   : > { %s1317_s16 = sshll.u32 %s2337_s24, 7  ;;  %352 = sbr.rel (%p349_p11) target bundleno = 310 (0x136), region = 52 }
  0x73   : > { %s369_s5 = sshra.s32 (!%p349_p11), %s1317_s16, 3 }
  0x74   : > { %s1318_s27 = sshll.u32 (!%p349_p11), %s369_s5, 2 }
  0x75   : > { %s2348_s20 = scalar_lea.vmem (!%p349_p11), [#allocation9], %s1318_s27 }
  0x77   : > { %v1535_v0 = vld [vmem:[%s2348_s20 + $0x38] sm:$0xff]  ;;  %v1534_v1 = vld [vmem:[%s2348_s20 + $0x30] sm:$0xff]  ;;  %v1533_v2 = vld [vmem:[%s2348_s20 + $0x28] sm:$0xff] }
  0x78   : > { %485 = vmatpush.bf16.msra.mxu0 %v1535_v0  ;;  %1570 = vmatpush.bf16.msra.mxu1 %v1535_v0  ;;  %v1532_v3 = vld [vmem:[%s2348_s20 + $0x20] sm:$0xff]  ;;  %v1531_v4 = vld [vmem:[%s2348_s20 + $0x18] sm:$0xff]  ;;  %v1530_v5 = vld [vmem:[%s2348_s20 + $0x10] sm:$0xff] }
  0x79   : > { %1571 = vmatpush.bf16.msra.mxu2 %v1535_v0  ;;  %1572 = vmatpush.bf16.msra.mxu3 %v1535_v0  ;;  %v1529_v6 = vld [vmem:[%s2348_s20 + $0x8] sm:$0xff]  ;;  %v1528_v7 = vld [vmem:[%s2348_s20] sm:$0xff]  ;;  %v1522_v9 = vld [vmem:[%s2319_s4 + $0x10] sm:$0xff] }
  0x7a   : > { %v1520_v8 = vld [vmem:[%s2319_s4] sm:$0xff]  ;;  %v1526_v11 = vld [vmem:[%s2319_s4 + $0x30] sm:$0xff]  ;;  %v1521_v12 = vld [vmem:[%s2319_s4 + $0x8] sm:$0xff] }
  0x7b   : > { %v1524_v10 = vld [vmem:[%s2319_s4 + $0x20] sm:$0xff]  ;;  %v1523_v13 = vld [vmem:[%s2319_s4 + $0x18] sm:$0xff]  ;;  %v1525_v14 = vld [vmem:[%s2319_s4 + $0x28] sm:$0xff] }
  0x7c   : > { %486 = vmatpush.bf16.msra.mxu0 %v1534_v1  ;;  %1573 = vmatpush.bf16.msra.mxu1 %v1534_v1  ;;  %v1527_v15 = vld [vmem:[%s2319_s4 + $0x38] sm:$0xff] }
  0x7d   : > { %1574 = vmatpush.bf16.msra.mxu2 %v1534_v1  ;;  %1575 = vmatpush.bf16.msra.mxu3 %v1534_v1 }
  0x80   : > { %487 = vmatpush.bf16.msra.mxu0 %v1533_v2  ;;  %1576 = vmatpush.bf16.msra.mxu1 %v1533_v2 }
  0x81   : > { %1577 = vmatpush.bf16.msra.mxu2 %v1533_v2  ;;  %1578 = vmatpush.bf16.msra.mxu3 %v1533_v2 }
  0x84   : > { %488 = vmatpush.bf16.msra.mxu0 %v1532_v3  ;;  %1579 = vmatpush.bf16.msra.mxu1 %v1532_v3 }
  0x85   : > { %1580 = vmatpush.bf16.msra.mxu2 %v1532_v3  ;;  %1581 = vmatpush.bf16.msra.mxu3 %v1532_v3 }
  0x88   : > { %489 = vmatpush.bf16.msra.mxu0 %v1531_v4  ;;  %1582 = vmatpush.bf16.msra.mxu1 %v1531_v4 }
  0x89   : > { %1583 = vmatpush.bf16.msra.mxu2 %v1531_v4  ;;  %1584 = vmatpush.bf16.msra.mxu3 %v1531_v4 }
  0x8c   : > { %490 = vmatpush.bf16.msra.mxu0 %v1530_v5  ;;  %1585 = vmatpush.bf16.msra.mxu1 %v1530_v5 }
  0x8d   : > { %1586 = vmatpush.bf16.msra.mxu2 %v1530_v5  ;;  %1587 = vmatpush.bf16.msra.mxu3 %v1530_v5 }
  0x90   : > { %491 = vmatpush.bf16.msra.mxu0 %v1529_v6  ;;  %1588 = vmatpush.bf16.msra.mxu1 %v1529_v6 }
  0x91   : > { %1589 = vmatpush.bf16.msra.mxu2 %v1529_v6  ;;  %1590 = vmatpush.bf16.msra.mxu3 %v1529_v6 }
  0x94   : > { %492 = vmatpush.bf16.msra.mxu0 %v1528_v7  ;;  %1591 = vmatpush.bf16.msra.mxu1 %v1528_v7 }
  0x95   : > { %1592 = vmatpush.bf16.msra.mxu2 %v1528_v7  ;;  %1593 = vmatpush.bf16.msra.mxu3 %v1528_v7 }
  0x97   : > { %493 = vmatmul.bf16.vlgmr.msra.gmra.mxu0 %v1520_v8  ;;  %503 = vmatmul.bf16.vlgmr.msra.gmra.mxu1 %v1522_v9 }
  0x98   : > { %513 = vmatmul.bf16.vlgmr.msra.gmra.mxu2 %v1524_v10  ;;  %523 = vmatmul.bf16.vlgmr.msra.gmra.mxu3 %v1526_v11 }
  0xa7   : > { %498 = vmatmul.bf16.gmra.mxu0 %v1521_v12  ;;  %508 = vmatmul.bf16.gmra.mxu1 %v1523_v13 }
  0xa8   : > { %518 = vmatmul.bf16.gmra.mxu2 %v1525_v14  ;;  %528 = vmatmul.bf16.gmra.mxu3 %v1527_v15 }
 0x114   : > { %v494_v16 = vpop.f32.mrf.mxu0  ;;  %v504_v17 = vpop.f32.mrf.mxu1 }
 0x115   : > { %534 = vst [vmem:[#allocation2 + $0x30] sm:$0xff] %v494_v16 }
 0x116   : > { %538 = vst [vmem:[#allocation2 + $0x50] sm:$0xff] %v504_v17 }
 0x11b   : > { %v514_v18 = vpop.f32.mrf.mxu2  ;;  %v524_v19 = vpop.f32.mrf.mxu3 }
 0x11c   : > { %542 = vst [vmem:[#allocation2 + $0x40] sm:$0xff] %v514_v18  ;;  %v496_v20 = vpop.f32.mrf.mxu0  ;;  %v506_v21 = vpop.f32.mrf.mxu1 }
 0x11d   : > { %546 = vst [vmem:[#allocation2 + $0x60] sm:$0xff] %v524_v19 }
 0x11e   : > { %535 = vst [vmem:[#allocation2] sm:$0xff] %v496_v20 }
 0x11f   : > { %539 = vst [vmem:[#allocation2 + $0x68] sm:$0xff] %v506_v21 }
 0x123   : > { %v516_v22 = vpop.f32.mrf.mxu2  ;;  %v526_v23 = vpop.f32.mrf.mxu3 }
 0x124   : > { %543 = vst [vmem:[#allocation2 + $0x20] sm:$0xff] %v516_v22  ;;  %v499_v24 = vpop.f32.mrf.mxu0  ;;  %v509_v25 = vpop.f32.mrf.mxu1 }
 0x125   : > { %547 = vst [vmem:[#allocation2 + $0x70] sm:$0xff] %v526_v23 }
 0x126   : > { %536 = vst [vmem:[#allocation2 + $0x58] sm:$0xff] %v499_v24 }
 0x127   : > { %540 = vst [vmem:[#allocation2 + $0x8] sm:$0xff] %v509_v25 }
 0x12b   : > { %v519_v26 = vpop.f32.mrf.mxu2  ;;  %v529_v27 = vpop.f32.mrf.mxu3 }
 0x12c   : > { %544 = vst [vmem:[#allocation2 + $0x10] sm:$0xff] %v519_v26  ;;  %v501_v28 = vpop.f32.mrf.mxu0  ;;  %v511_v29 = vpop.f32.mrf.mxu1 }
 0x12d   : > { %548 = vst [vmem:[#allocation2 + $0x78] sm:$0xff] %v529_v27 }
 0x12e   : > { %537 = vst [vmem:[#allocation2 + $0x18] sm:$0xff] %v501_v28 }
 0x12f   : > { %541 = vst [vmem:[#allocation2 + $0x48] sm:$0xff] %v511_v29 }
 0x133   : > { %v521_v30 = vpop.f32.mrf.mxu2  ;;  %v531_v31 = vpop.f32.mrf.mxu3 }
 0x134   : > { %545 = vst [vmem:[#allocation2 + $0x38] sm:$0xff] %v521_v30 }
 0x135   : > { %549 = vst [vmem:[#allocation2 + $0x28] sm:$0xff] %v531_v31 }
 0x136 PF: > { %s2579_s10 = sld [smem:[#allocation20_spill]] }
 0x13c   : > { %p550_p0 = scmp.gt.s32.totalorder %s2579_s10, 0  ;;  %p551_p2 = scmp.lt.s32.totalorder %s2579_s10, %s2334_s19 }
 0x13e   : > { %p552_p4 = pnand %p551_p2, %p550_p0 }
 0x13f   : > { %s588_s3 = sshra.s32 (!%p552_p4), %s1317_s16, 3 }
 0x140   : > { %555 = sbr.rel (%p552_p4) target bundleno = 518 (0x206), region = 56  ;;  %s1383_s12 = sshll.u32 (!%p552_p4), %s588_s3, 2 }
 0x141   : > { %s2371_s14 = scalar_lea.vmem (!%p552_p4), [#allocation9], %s1383_s12 }
 0x145   : > { %v1551_v32 = vld [vmem:[%s2371_s14 + $0x38] sm:$0xff]  ;;  %v1550_v33 = vld [vmem:[%s2371_s14 + $0x30] sm:$0xff]  ;;  %v1549_v34 = vld [vmem:[%s2371_s14 + $0x28] sm:$0xff] }
 0x146   : > { %704 = vmatpush.bf16.msra.mxu0 %v1551_v32  ;;  %1594 = vmatpush.bf16.msra.mxu1 %v1551_v32  ;;  %v1548_v35 = vld [vmem:[%s2371_s14 + $0x20] sm:$0xff]  ;;  %v1547_v36 = vld [vmem:[%s2371_s14 + $0x18] sm:$0xff]  ;;  %v1546_v37 = vld [vmem:[%s2371_s14 + $0x10] sm:$0xff] }
 0x147   : > { %1595 = vmatpush.bf16.msra.mxu2 %v1551_v32  ;;  %1596 = vmatpush.bf16.msra.mxu3 %v1551_v32  ;;  %v1545_v38 = vld [vmem:[%s2371_s14 + $0x8] sm:$0xff]  ;;  %v1544_v39 = vld [vmem:[%s2371_s14] sm:$0xff]  ;;  %v1538_v41 = vld [vmem:[%s2319_s4 + $0x10] sm:$0xff] }
 0x148   : > { %v1536_v40 = vld [vmem:[%s2319_s4] sm:$0xff]  ;;  %v1542_v43 = vld [vmem:[%s2319_s4 + $0x30] sm:$0xff]  ;;  %v1537_v44 = vld [vmem:[%s2319_s4 + $0x8] sm:$0xff] }
 0x149   : > { %v1540_v42 = vld [vmem:[%s2319_s4 + $0x20] sm:$0xff]  ;;  %v1539_v45 = vld [vmem:[%s2319_s4 + $0x18] sm:$0xff]  ;;  %v1541_v46 = vld [vmem:[%s2319_s4 + $0x28] sm:$0xff] }
 0x14a   : > { %705 = vmatpush.bf16.msra.mxu0 %v1550_v33  ;;  %1597 = vmatpush.bf16.msra.mxu1 %v1550_v33  ;;  %v1543_v47 = vld [vmem:[%s2319_s4 + $0x38] sm:$0xff]  ;;  %v556_v48 = vld [vmem:[#allocation2 + $0x30] sm:$0xff]  ;;  %v564_v54 = vld [vmem:[#allocation2 + $0x40] sm:$0xff] }
 0x14b   : > { %1598 = vmatpush.bf16.msra.mxu2 %v1550_v33  ;;  %1599 = vmatpush.bf16.msra.mxu3 %v1550_v33  ;;  %v560_v49 = vld [vmem:[#allocation2 + $0x50] sm:$0xff]  ;;  %v568_v55 = vld [vmem:[#allocation2 + $0x60] sm:$0xff]  ;;  %v561_v57 = vld [vmem:[#allocation2 + $0x68] sm:$0xff] }
 0x14c   : > { %v557_v56 = vld [vmem:[#allocation2] sm:$0xff]  ;;  %v569_v3 = vld [vmem:[#allocation2 + $0x70] sm:$0xff]  ;;  %v558_v4 = vld [vmem:[#allocation2 + $0x58] sm:$0xff] }
 0x14d   : > { %v565_v2 = vld [vmem:[#allocation2 + $0x20] sm:$0xff]  ;;  %v562_v5 = vld [vmem:[#allocation2 + $0x8] sm:$0xff]  ;;  %v566_v14 = vld [vmem:[#allocation2 + $0x10] sm:$0xff] }
 0x14e   : > { %706 = vmatpush.bf16.msra.mxu0 %v1549_v34  ;;  %1600 = vmatpush.bf16.msra.mxu1 %v1549_v34  ;;  %v570_v15 = vld [vmem:[#allocation2 + $0x78] sm:$0xff]  ;;  %v563_v17 = vld [vmem:[#allocation2 + $0x48] sm:$0xff] }
 0x14f   : > { %1601 = vmatpush.bf16.msra.mxu2 %v1549_v34  ;;  %1602 = vmatpush.bf16.msra.mxu3 %v1549_v34  ;;  %v559_v16 = vld [vmem:[#allocation2 + $0x18] sm:$0xff]  ;;  %v571_v27 = vld [vmem:[#allocation2 + $0x28] sm:$0xff] }
 0x150   : > { %v567_v26 = vld [vmem:[#allocation2 + $0x38] sm:$0xff] }
 0x152   : > { %707 = vmatpush.bf16.msra.mxu0 %v1548_v35  ;;  %1603 = vmatpush.bf16.msra.mxu1 %v1548_v35 }
 0x153   : > { %1604 = vmatpush.bf16.msra.mxu2 %v1548_v35  ;;  %1605 = vmatpush.bf16.msra.mxu3 %v1548_v35 }
 0x156   : > { %708 = vmatpush.bf16.msra.mxu0 %v1547_v36  ;;  %1606 = vmatpush.bf16.msra.mxu1 %v1547_v36 }
 0x157   : > { %1607 = vmatpush.bf16.msra.mxu2 %v1547_v36  ;;  %1608 = vmatpush.bf16.msra.mxu3 %v1547_v36 }
 0x15a   : > { %709 = vmatpush.bf16.msra.mxu0 %v1546_v37  ;;  %1609 = vmatpush.bf16.msra.mxu1 %v1546_v37 }
 0x15b   : > { %1610 = vmatpush.bf16.msra.mxu2 %v1546_v37  ;;  %1611 = vmatpush.bf16.msra.mxu3 %v1546_v37 }
 0x15e   : > { %710 = vmatpush.bf16.msra.mxu0 %v1545_v38  ;;  %1612 = vmatpush.bf16.msra.mxu1 %v1545_v38 }
 0x15f   : > { %1613 = vmatpush.bf16.msra.mxu2 %v1545_v38  ;;  %1614 = vmatpush.bf16.msra.mxu3 %v1545_v38 }
 0x162   : > { %711 = vmatpush.bf16.msra.mxu0 %v1544_v39  ;;  %1615 = vmatpush.bf16.msra.mxu1 %v1544_v39 }
 0x163   : > { %1616 = vmatpush.bf16.msra.mxu2 %v1544_v39  ;;  %1617 = vmatpush.bf16.msra.mxu3 %v1544_v39 }
 0x165   : > { %712 = vmatmul.bf16.vlgmr.msra.gmra.mxu0 %v1536_v40  ;;  %722 = vmatmul.bf16.vlgmr.msra.gmra.mxu1 %v1538_v41 }
 0x166   : > { %732 = vmatmul.bf16.vlgmr.msra.gmra.mxu2 %v1540_v42  ;;  %742 = vmatmul.bf16.vlgmr.msra.gmra.mxu3 %v1542_v43 }
 0x175   : > { %717 = vmatmul.bf16.gmra.mxu0 %v1537_v44  ;;  %727 = vmatmul.bf16.gmra.mxu1 %v1539_v45 }
 0x176   : > { %737 = vmatmul.bf16.gmra.mxu2 %v1541_v46  ;;  %747 = vmatmul.bf16.gmra.mxu3 %v1543_v47 }
 0x1e2   : > { %v713_v50 = vpop.f32.mrf.mxu0  ;;  %v723_v51 = vpop.f32.mrf.mxu1 }
 0x1e3   : > { %v753_v52 = vadd.f32 %v713_v50, %v556_v48  ;;  %v757_v53 = vadd.f32 %v723_v51, %v560_v49 }
 0x1e5   : > { %769 = vst [vmem:[#allocation2 + $0x30] sm:$0xff] %v753_v52 }
 0x1e6   : > { %773 = vst [vmem:[#allocation2 + $0x50] sm:$0xff] %v757_v53 }
 0x1e9   : > { %v733_v58 = vpop.f32.mrf.mxu2  ;;  %v743_v59 = vpop.f32.mrf.mxu3 }
 0x1ea   : > { %v761_v60 = vadd.f32 %v733_v58, %v564_v54  ;;  %v765_v61 = vadd.f32 %v743_v59, %v568_v55  ;;  %v715_v62 = vpop.f32.mrf.mxu0  ;;  %v725_v63 = vpop.f32.mrf.mxu1 }
 0x1eb   : > { %v754_v0 = vadd.f32 %v715_v62, %v557_v56  ;;  %v758_v1 = vadd.f32 %v725_v63, %v561_v57 }
 0x1ec   : > { %777 = vst [vmem:[#allocation2 + $0x40] sm:$0xff] %v761_v60 }
 0x1ed   : > { %781 = vst [vmem:[#allocation2 + $0x60] sm:$0xff] %v765_v61 }
 0x1ee   : > { %770 = vst [vmem:[#allocation2] sm:$0xff] %v754_v0 }
 0x1ef   : > { %774 = vst [vmem:[#allocation2 + $0x68] sm:$0xff] %v758_v1 }
 0x1f1   : > { %v735_v6 = vpop.f32.mrf.mxu2  ;;  %v745_v7 = vpop.f32.mrf.mxu3 }
 0x1f2   : > { %v762_v8 = vadd.f32 %v735_v6, %v565_v2  ;;  %v766_v9 = vadd.f32 %v745_v7, %v569_v3  ;;  %v718_v10 = vpop.f32.mrf.mxu0  ;;  %v728_v11 = vpop.f32.mrf.mxu1 }
 0x1f3   : > { %v755_v12 = vadd.f32 %v718_v10, %v558_v4  ;;  %v759_v13 = vadd.f32 %v728_v11, %v562_v5 }
 0x1f4   : > { %778 = vst [vmem:[#allocation2 + $0x20] sm:$0xff] %v762_v8 }
 0x1f5   : > { %782 = vst [vmem:[#allocation2 + $0x70] sm:$0xff] %v766_v9 }
 0x1f6   : > { %771 = vst [vmem:[#allocation2 + $0x58] sm:$0xff] %v755_v12 }
 0x1f7   : > { %775 = vst [vmem:[#allocation2 + $0x8] sm:$0xff] %v759_v13 }
 0x1f9   : > { %v738_v18 = vpop.f32.mrf.mxu2  ;;  %v748_v19 = vpop.f32.mrf.mxu3 }
 0x1fa   : > { %v763_v20 = vadd.f32 %v738_v18, %v566_v14  ;;  %v767_v21 = vadd.f32 %v748_v19, %v570_v15  ;;  %v720_v22 = vpop.f32.mrf.mxu0  ;;  %v730_v23 = vpop.f32.mrf.mxu1 }
 0x1fb   : > { %v756_v24 = vadd.f32 %v720_v22, %v559_v16  ;;  %v760_v25 = vadd.f32 %v730_v23, %v563_v17 }
 0x1fc   : > { %779 = vst [vmem:[#allocation2 + $0x10] sm:$0xff] %v763_v20 }
 0x1fd   : > { %783 = vst [vmem:[#allocation2 + $0x78] sm:$0xff] %v767_v21 }
 0x1fe   : > { %772 = vst [vmem:[#allocation2 + $0x18] sm:$0xff] %v756_v24 }
 0x1ff   : > { %776 = vst [vmem:[#allocation2 + $0x48] sm:$0xff] %v760_v25 }
 0x201   : > { %v740_v28 = vpop.f32.mrf.mxu2  ;;  %v750_v29 = vpop.f32.mrf.mxu3 }
 0x202   : > { %v764_v30 = vadd.f32 %v740_v28, %v567_v26  ;;  %v768_v31 = vadd.f32 %v750_v29, %v571_v27 }
 0x204   : > { %780 = vst [vmem:[#allocation2 + $0x38] sm:$0xff] %v764_v30 }
 0x205   : > { %784 = vst [vmem:[#allocation2 + $0x28] sm:$0xff] %v768_v31 }
 0x206 PF: > { %p785_p5 = scmp.eq.s32.totalorder %s2334_s19, 0 }
 0x208   : > { %p786_p6 = pnand %p785_p5, %p347_p1 }
 0x20a   : > { %789 = sbr.rel (%p786_p6) target bundleno = 544 (0x220), region = 60 }
 0x20f   : > { %v2085_v32 = vmov 0.0  }
 0x210   : > { %790 = vst [vmem:[#allocation2 + $0x30] sm:$0xff] %v2085_v32 }
 0x211   : > { %791 = vst [vmem:[#allocation2] sm:$0xff] %v2085_v32 }
 0x212   : > { %792 = vst [vmem:[#allocation2 + $0x58] sm:$0xff] %v2085_v32 }
 0x213   : > { %793 = vst [vmem:[#allocation2 + $0x18] sm:$0xff] %v2085_v32 }
 0x214   : > { %794 = vst [vmem:[#allocation2 + $0x50] sm:$0xff] %v2085_v32 }
 0x215   : > { %795 = vst [vmem:[#allocation2 + $0x68] sm:$0xff] %v2085_v32 }
 0x216   : > { %796 = vst [vmem:[#allocation2 + $0x8] sm:$0xff] %v2085_v32 }
 0x217   : > { %797 = vst [vmem:[#allocation2 + $0x48] sm:$0xff] %v2085_v32 }
 0x218   : > { %798 = vst [vmem:[#allocation2 + $0x40] sm:$0xff] %v2085_v32 }
 0x219   : > { %799 = vst [vmem:[#allocation2 + $0x20] sm:$0xff] %v2085_v32 }
 0x21a   : > { %800 = vst [vmem:[#allocation2 + $0x10] sm:$0xff] %v2085_v32 }
 0x21b   : > { %801 = vst [vmem:[#allocation2 + $0x38] sm:$0xff] %v2085_v32 }
 0x21c   : > { %802 = vst [vmem:[#allocation2 + $0x60] sm:$0xff] %v2085_v32 }
 0x21d   : > { %803 = vst [vmem:[#allocation2 + $0x70] sm:$0xff] %v2085_v32 }
 0x21e   : > { %804 = vst [vmem:[#allocation2 + $0x78] sm:$0xff] %v2085_v32 }
 0x21f   : > { %805 = vst [vmem:[#allocation2 + $0x28] sm:$0xff] %v2085_v32 }
 0x220 PF: > { %s2581_s25 = sld [smem:[#allocation20_spill]] }
 0x221   : > { %s2582_s22 = sld [smem:[#allocation21_spill]] }
 0x226   : > { %p806_p8 = scmp.eq.s32.totalorder %s2581_s25, 1 }
 0x227   : > { %p807_p10 = scmp.eq.s32.totalorder %s2582_s22, 0 }
 0x229   : > { %p808_p12 = pnand %p807_p10, %p806_p8 }
 0x22a   : > { %s2583_s21 = sld [smem:[#allocation31_spill]] (!%p808_p12) }
 0x22b   : > { %811 = sbr.rel (%p808_p12) target bundleno = 753 (0x2f1), region = 64 }
 0x230   : > { %v1559_v33 = vld [vmem:[#allocation11 + $0x38] sm:$0xff]  ;;  %v1558_v34 = vld [vmem:[#allocation11 + $0x30] sm:$0xff]  ;;  %v1557_v35 = vld [vmem:[#allocation11 + $0x28] sm:$0xff] }
 0x231   : > { %904 = vmatpush.bf16.msra.mxu0 %v1559_v33  ;;  %1618 = vmatpush.bf16.msra.mxu1 %v1559_v33  ;;  %v1556_v36 = vld [vmem:[#allocation11 + $0x20] sm:$0xff]  ;;  %v1555_v37 = vld [vmem:[#allocation11 + $0x18] sm:$0xff]  ;;  %v1554_v38 = vld [vmem:[#allocation11 + $0x10] sm:$0xff] }
 0x232   : > { %1619 = vmatpush.bf16.msra.mxu2 %v1559_v33  ;;  %1620 = vmatpush.bf16.msra.mxu3 %v1559_v33  ;;  %v1553_v39 = vld [vmem:[#allocation11 + $0x8] sm:$0xff]  ;;  %v1552_v40 = vld [vmem:[#allocation11] sm:$0xff]  ;;  %v812_v41 = vld [vmem:[#allocation2 + $0x30] sm:$0xff] }
 0x233   : > { %v813_v42 = vld [vmem:[#allocation2] sm:$0xff]  ;;  %v816_v43 = vld [vmem:[#allocation2 + $0x50] sm:$0xff]  ;;  %v817_v44 = vld [vmem:[#allocation2 + $0x68] sm:$0xff] }
 0x234   : > { %v820_v45 = vld [vmem:[#allocation2 + $0x40] sm:$0xff]  ;;  %v825_v48 = vld [vmem:[#allocation2 + $0x70] sm:$0xff]  ;;  %v828_v49 = vpack.c.bf16 %v813_v42, %v812_v41  ;;  %v830_v50 = vpack.c.bf16 %v817_v44, %v816_v43  ;;  %v814_v53 = vld [vmem:[#allocation2 + $0x58] sm:$0xff] }
 0x235   : > { %905 = vmatpush.bf16.msra.mxu0 %v1558_v34  ;;  %1621 = vmatpush.bf16.msra.mxu1 %v1558_v34  ;;  %v821_v46 = vld [vmem:[#allocation2 + $0x20] sm:$0xff]  ;;  %v815_v54 = vld [vmem:[#allocation2 + $0x18] sm:$0xff]  ;;  %v818_v55 = vld [vmem:[#allocation2 + $0x8] sm:$0xff] }
 0x236   : > { %1622 = vmatpush.bf16.msra.mxu2 %v1558_v34  ;;  %1623 = vmatpush.bf16.msra.mxu3 %v1558_v34  ;;  %v824_v47 = vld [vmem:[#allocation2 + $0x60] sm:$0xff]  ;;  %v832_v51 = vpack.c.bf16 %v821_v46, %v820_v45  ;;  %v819_v56 = vld [vmem:[#allocation2 + $0x48] sm:$0xff]  ;;  %v822_v57 = vld [vmem:[#allocation2 + $0x10] sm:$0xff]  ;;  %v829_v61 = vpack.c.bf16 %v815_v54, %v814_v53 }
 0x237   : > { %v834_v52 = vpack.c.bf16 %v825_v48, %v824_v47  ;;  %v823_v58 = vld [vmem:[#allocation2 + $0x38] sm:$0xff]  ;;  %v827_v60 = vld [vmem:[#allocation2 + $0x28] sm:$0xff]  ;;  %v831_v62 = vpack.c.bf16 %v819_v56, %v818_v55  ;;  %v1817_v1 = vld [vmem:[%s2583_s21] ss:$0 sm:$0xff] }
 0x238   : > { %v826_v59 = vld [vmem:[#allocation2 + $0x78] sm:$0xff]  ;;  %v833_v63 = vpack.c.bf16 %v823_v58, %v822_v57 }
 0x239   : > { %906 = vmatpush.bf16.msra.mxu0 %v1557_v35  ;;  %1624 = vmatpush.bf16.msra.mxu1 %v1557_v35  ;;  %v835_v0 = vpack.c.bf16 %v827_v60, %v826_v59 }
 0x23a   : > { %1625 = vmatpush.bf16.msra.mxu2 %v1557_v35  ;;  %1626 = vmatpush.bf16.msra.mxu3 %v1557_v35 }
 0x23d   : > { %907 = vmatpush.bf16.msra.mxu0 %v1556_v36  ;;  %1627 = vmatpush.bf16.msra.mxu1 %v1556_v36 }
 0x23e   : > { %1628 = vmatpush.bf16.msra.mxu2 %v1556_v36  ;;  %1629 = vmatpush.bf16.msra.mxu3 %v1556_v36 }
 0x241   : > { %908 = vmatpush.bf16.msra.mxu0 %v1555_v37  ;;  %1630 = vmatpush.bf16.msra.mxu1 %v1555_v37 }
 0x242   : > { %1631 = vmatpush.bf16.msra.mxu2 %v1555_v37  ;;  %1632 = vmatpush.bf16.msra.mxu3 %v1555_v37 }
 0x245   : > { %909 = vmatpush.bf16.msra.mxu0 %v1554_v38  ;;  %1633 = vmatpush.bf16.msra.mxu1 %v1554_v38 }
 0x246   : > { %1634 = vmatpush.bf16.msra.mxu2 %v1554_v38  ;;  %1635 = vmatpush.bf16.msra.mxu3 %v1554_v38 }
 0x249   : > { %910 = vmatpush.bf16.msra.mxu0 %v1553_v39  ;;  %1636 = vmatpush.bf16.msra.mxu1 %v1553_v39 }
 0x24a   : > { %1637 = vmatpush.bf16.msra.mxu2 %v1553_v39  ;;  %1638 = vmatpush.bf16.msra.mxu3 %v1553_v39 }
 0x24d   : > { %911 = vmatpush.bf16.msra.mxu0 %v1552_v40  ;;  %1639 = vmatpush.bf16.msra.mxu1 %v1552_v40 }
 0x24e   : > { %1640 = vmatpush.bf16.msra.mxu2 %v1552_v40  ;;  %1641 = vmatpush.bf16.msra.mxu3 %v1552_v40 }
 0x250   : > { %912 = vmatmul.bf16.vlgmr.msra.gmra.mxu0 %v828_v49  ;;  %922 = vmatmul.bf16.vlgmr.msra.gmra.mxu1 %v830_v50 }
 0x251   : > { %932 = vmatmul.bf16.vlgmr.msra.gmra.mxu2 %v832_v51  ;;  %942 = vmatmul.bf16.vlgmr.msra.gmra.mxu3 %v834_v52 }
 0x260   : > { %917 = vmatmul.bf16.gmra.mxu0 %v829_v61  ;;  %927 = vmatmul.bf16.gmra.mxu1 %v831_v62 }
 0x261   : > { %937 = vmatmul.bf16.gmra.mxu2 %v833_v63  ;;  %947 = vmatmul.bf16.gmra.mxu3 %v835_v0 }
 0x2cd   : > { %v913_v2 = vpop.f32.mrf.mxu0  ;;  %v923_v3 = vpop.f32.mrf.mxu1 }
 0x2ce   : > { %v914_v4 = vadd.f32 %v1817_v1, %v913_v2  ;;  %v924_v5 = vadd.f32 %v1817_v1, %v923_v3 }
 0x2d0   : > { %953 = vst [vmem:[%s2344_s23] sm:$0xff] %v914_v4 }
 0x2d1   : > { %957 = vst [vmem:[%s2344_s23 + $0x20] sm:$0xff] %v924_v5 }
 0x2d4   : > { %v933_v6 = vpop.f32.mrf.mxu2  ;;  %v943_v7 = vpop.f32.mrf.mxu3 }
 0x2d5   : > { %v934_v8 = vadd.f32 %v1817_v1, %v933_v6  ;;  %v944_v9 = vadd.f32 %v1817_v1, %v943_v7  ;;  %v915_v10 = vpop.f32.mrf.mxu0  ;;  %v925_v11 = vpop.f32.mrf.mxu1 }
 0x2d6   : > { %v916_v12 = vadd.f32 %v1817_v1, %v915_v10  ;;  %v926_v13 = vadd.f32 %v1817_v1, %v925_v11 }
 0x2d7   : > { %961 = vst [vmem:[%s2344_s23 + $0x40] sm:$0xff] %v934_v8 }
 0x2d8   : > { %965 = vst [vmem:[%s2344_s23 + $0x60] sm:$0xff] %v944_v9 }
 0x2d9   : > { %954 = vst [vmem:[%s2344_s23 + $0x8] sm:$0xff] %v916_v12 }
 0x2da   : > { %958 = vst [vmem:[%s2344_s23 + $0x28] sm:$0xff] %v926_v13 }
 0x2dc   : > { %v935_v14 = vpop.f32.mrf.mxu2  ;;  %v945_v15 = vpop.f32.mrf.mxu3 }
 0x2dd   : > { %v936_v16 = vadd.f32 %v1817_v1, %v935_v14  ;;  %v946_v17 = vadd.f32 %v1817_v1, %v945_v15  ;;  %v918_v18 = vpop.f32.mrf.mxu0  ;;  %v928_v19 = vpop.f32.mrf.mxu1 }
 0x2de   : > { %v919_v20 = vadd.f32 %v1817_v1, %v918_v18  ;;  %v929_v21 = vadd.f32 %v1817_v1, %v928_v19 }
 0x2df   : > { %962 = vst [vmem:[%s2344_s23 + $0x48] sm:$0xff] %v936_v16 }
 0x2e0   : > { %966 = vst [vmem:[%s2344_s23 + $0x68] sm:$0xff] %v946_v17 }
 0x2e1   : > { %955 = vst [vmem:[%s2344_s23 + $0x10] sm:$0xff] %v919_v20 }
 0x2e2   : > { %959 = vst [vmem:[%s2344_s23 + $0x30] sm:$0xff] %v929_v21 }
 0x2e4   : > { %v938_v22 = vpop.f32.mrf.mxu2  ;;  %v948_v23 = vpop.f32.mrf.mxu3 }
 0x2e5   : > { %v939_v24 = vadd.f32 %v1817_v1, %v938_v22  ;;  %v949_v25 = vadd.f32 %v1817_v1, %v948_v23  ;;  %v920_v26 = vpop.f32.mrf.mxu0  ;;  %v930_v27 = vpop.f32.mrf.mxu1 }
 0x2e6   : > { %v921_v28 = vadd.f32 %v1817_v1, %v920_v26  ;;  %v931_v29 = vadd.f32 %v1817_v1, %v930_v27 }
 0x2e7   : > { %963 = vst [vmem:[%s2344_s23 + $0x50] sm:$0xff] %v939_v24 }
 0x2e8   : > { %967 = vst [vmem:[%s2344_s23 + $0x70] sm:$0xff] %v949_v25 }
 0x2e9   : > { %956 = vst [vmem:[%s2344_s23 + $0x18] sm:$0xff] %v921_v28 }
 0x2ea   : > { %960 = vst [vmem:[%s2344_s23 + $0x38] sm:$0xff] %v931_v29 }
 0x2ec   : > { %v940_v30 = vpop.f32.mrf.mxu2  ;;  %v950_v31 = vpop.f32.mrf.mxu3 }
 0x2ed   : > { %v941_v32 = vadd.f32 %v1817_v1, %v940_v30  ;;  %v951_v33 = vadd.f32 %v1817_v1, %v950_v31 }
 0x2ef   : > { %964 = vst [vmem:[%s2344_s23 + $0x58] sm:$0xff] %v941_v32 }
 0x2f0   : > { %968 = vst [vmem:[%s2344_s23 + $0x78] sm:$0xff] %v951_v33 }
 0x2f1 PF: > { %s2584_s9 = sld [smem:[#allocation21_spill]] }
 0x2f7   : > { %p969_p13 = scmp.gt.s32.totalorder %s2584_s9, 0 }
 0x2f9   : > { %p970_p1 = pnand %p969_p13, %p806_p8 }
 0x2fa   : > { %s2586_s18 = sld [smem:[#allocation21_spill]] (!%p970_p1) }
 0x2fb   : > { %973 = sbr.rel (%p970_p1) target bundleno = 963 (0x3c3), region = 68 }
 0x300   : > { %s1560_s17 = sshll.u32 %s2586_s18, 6  ;;  %v990_v41 = vld [vmem:[#allocation2 + $0x30] sm:$0xff]  ;;  %v991_v42 = vld [vmem:[#allocation2] sm:$0xff]  ;;  %v995_v45 = vld [vmem:[#allocation2 + $0x68] sm:$0xff] }
 0x301   : > { %s2419_s24 = scalar_lea.vmem [#allocation11], %s1560_s17  ;;  %v994_v43 = vld [vmem:[#allocation2 + $0x50] sm:$0xff]  ;;  %v998_v46 = vld [vmem:[#allocation2 + $0x40] sm:$0xff]  ;;  %v1006_v50 = vpack.c.bf16 %v991_v42, %v990_v41  ;;  %v992_v54 = vld [vmem:[#allocation2 + $0x58] sm:$0xff] }
 0x302   : > { %v1568_v34 = vld [vmem:[%s2419_s24 + $0x38] sm:$0xff]  ;;  %v1567_v35 = vld [vmem:[%s2419_s24 + $0x30] sm:$0xff]  ;;  %v1566_v36 = vld [vmem:[%s2419_s24 + $0x28] sm:$0xff]  ;;  %v1008_v51 = vpack.c.bf16 %v995_v45, %v994_v43 }
 0x303   : > { %1081 = vmatpush.bf16.msra.mxu0 %v1568_v34  ;;  %1642 = vmatpush.bf16.msra.mxu1 %v1568_v34  ;;  %v1565_v37 = vld [vmem:[%s2419_s24 + $0x20] sm:$0xff]  ;;  %v1564_v38 = vld [vmem:[%s2419_s24 + $0x18] sm:$0xff]  ;;  %v1563_v39 = vld [vmem:[%s2419_s24 + $0x10] sm:$0xff] }
 0x304   : > { %1643 = vmatpush.bf16.msra.mxu2 %v1568_v34  ;;  %1644 = vmatpush.bf16.msra.mxu3 %v1568_v34  ;;  %v1562_v40 = vld [vmem:[%s2419_s24 + $0x8] sm:$0xff]  ;;  %v1561_v44 = vld [vmem:[%s2419_s24] sm:$0xff]  ;;  %v1003_v49 = vld [vmem:[#allocation2 + $0x70] sm:$0xff] }
 0x305   : > { %v999_v47 = vld [vmem:[#allocation2 + $0x20] sm:$0xff]  ;;  %v993_v55 = vld [vmem:[#allocation2 + $0x18] sm:$0xff]  ;;  %v996_v56 = vld [vmem:[#allocation2 + $0x8] sm:$0xff] }
 0x306   : > { %v1002_v48 = vld [vmem:[#allocation2 + $0x60] sm:$0xff]  ;;  %v1010_v52 = vpack.c.bf16 %v999_v47, %v998_v46  ;;  %v997_v57 = vld [vmem:[#allocation2 + $0x48] sm:$0xff]  ;;  %v1000_v58 = vld [vmem:[#allocation2 + $0x10] sm:$0xff]  ;;  %v1007_v62 = vpack.c.bf16 %v993_v55, %v992_v54 }
 0x307   : > { %1082 = vmatpush.bf16.msra.mxu0 %v1567_v35  ;;  %1645 = vmatpush.bf16.msra.mxu1 %v1567_v35  ;;  %v1012_v53 = vpack.c.bf16 %v1003_v49, %v1002_v48  ;;  %v1001_v59 = vld [vmem:[#allocation2 + $0x38] sm:$0xff]  ;;  %v1005_v61 = vld [vmem:[#allocation2 + $0x28] sm:$0xff]  ;;  %v1009_v63 = vpack.c.bf16 %v997_v57, %v996_v56  ;;  %v974_v2 = vld [vmem:[%s2344_s23] sm:$0xff] }
 0x308   : > { %1646 = vmatpush.bf16.msra.mxu2 %v1567_v35  ;;  %1647 = vmatpush.bf16.msra.mxu3 %v1567_v35  ;;  %v1004_v60 = vld [vmem:[#allocation2 + $0x78] sm:$0xff]  ;;  %v1011_v0 = vpack.c.bf16 %v1001_v59, %v1000_v58  ;;  %v978_v3 = vld [vmem:[%s2344_s23 + $0x20] sm:$0xff]  ;;  %v975_v10 = vld [vmem:[%s2344_s23 + $0x8] sm:$0xff] }
 0x309   : > { %v1013_v1 = vpack.c.bf16 %v1005_v61, %v1004_v60  ;;  %v982_v8 = vld [vmem:[%s2344_s23 + $0x40] sm:$0xff]  ;;  %v979_v11 = vld [vmem:[%s2344_s23 + $0x28] sm:$0xff]  ;;  %v976_v22 = vld [vmem:[%s2344_s23 + $0x10] sm:$0xff] }
 0x30a   : > { %v986_v9 = vld [vmem:[%s2344_s23 + $0x60] sm:$0xff]  ;;  %v983_v20 = vld [vmem:[%s2344_s23 + $0x48] sm:$0xff]  ;;  %v980_v23 = vld [vmem:[%s2344_s23 + $0x30] sm:$0xff] }
 0x30b   : > { %1083 = vmatpush.bf16.msra.mxu0 %v1566_v36  ;;  %1648 = vmatpush.bf16.msra.mxu1 %v1566_v36  ;;  %v987_v21 = vld [vmem:[%s2344_s23 + $0x68] sm:$0xff]  ;;  %v984_v32 = vld [vmem:[%s2344_s23 + $0x50] sm:$0xff]  ;;  %v977_v34 = vld [vmem:[%s2344_s23 + $0x18] sm:$0xff] }
 0x30c   : > { %1649 = vmatpush.bf16.msra.mxu2 %v1566_v36  ;;  %1650 = vmatpush.bf16.msra.mxu3 %v1566_v36  ;;  %v988_v33 = vld [vmem:[%s2344_s23 + $0x70] sm:$0xff]  ;;  %v981_v35 = vld [vmem:[%s2344_s23 + $0x38] sm:$0xff] }
 0x30d   : > { %v989_v45 = vld [vmem:[%s2344_s23 + $0x78] sm:$0xff] }
 0x30f   : > { %1084 = vmatpush.bf16.msra.mxu0 %v1565_v37  ;;  %1651 = vmatpush.bf16.msra.mxu1 %v1565_v37 }
 0x310   : > { %1652 = vmatpush.bf16.msra.mxu2 %v1565_v37  ;;  %1653 = vmatpush.bf16.msra.mxu3 %v1565_v37 }
 0x313   : > { %1085 = vmatpush.bf16.msra.mxu0 %v1564_v38  ;;  %1654 = vmatpush.bf16.msra.mxu1 %v1564_v38 }
 0x314   : > { %1655 = vmatpush.bf16.msra.mxu2 %v1564_v38  ;;  %1656 = vmatpush.bf16.msra.mxu3 %v1564_v38 }
 0x317   : > { %1086 = vmatpush.bf16.msra.mxu0 %v1563_v39  ;;  %1657 = vmatpush.bf16.msra.mxu1 %v1563_v39 }
 0x318   : > { %1658 = vmatpush.bf16.msra.mxu2 %v1563_v39  ;;  %1659 = vmatpush.bf16.msra.mxu3 %v1563_v39 }
 0x31b   : > { %1087 = vmatpush.bf16.msra.mxu0 %v1562_v40  ;;  %1660 = vmatpush.bf16.msra.mxu1 %v1562_v40 }
 0x31c   : > { %1661 = vmatpush.bf16.msra.mxu2 %v1562_v40  ;;  %1662 = vmatpush.bf16.msra.mxu3 %v1562_v40 }
 0x31f   : > { %1088 = vmatpush.bf16.msra.mxu0 %v1561_v44  ;;  %1663 = vmatpush.bf16.msra.mxu1 %v1561_v44 }
 0x320   : > { %1664 = vmatpush.bf16.msra.mxu2 %v1561_v44  ;;  %1665 = vmatpush.bf16.msra.mxu3 %v1561_v44  ;;  %v985_v44 = vld [vmem:[%s2344_s23 + $0x58] sm:$0xff] }
 0x322   : > { %1089 = vmatmul.bf16.vlgmr.msra.gmra.mxu0 %v1006_v50  ;;  %1099 = vmatmul.bf16.vlgmr.msra.gmra.mxu1 %v1008_v51 }
 0x323   : > { %1109 = vmatmul.bf16.vlgmr.msra.gmra.mxu2 %v1010_v52  ;;  %1119 = vmatmul.bf16.vlgmr.msra.gmra.mxu3 %v1012_v53 }
 0x332   : > { %1094 = vmatmul.bf16.gmra.mxu0 %v1007_v62  ;;  %1104 = vmatmul.bf16.gmra.mxu1 %v1009_v63 }
 0x333   : > { %1114 = vmatmul.bf16.gmra.mxu2 %v1011_v0  ;;  %1124 = vmatmul.bf16.gmra.mxu3 %v1013_v1 }
 0x39f   : > { %v1090_v4 = vpop.f32.mrf.mxu0  ;;  %v1100_v5 = vpop.f32.mrf.mxu1 }
 0x3a0   : > { %v1130_v6 = vadd.f32 %v1090_v4, %v974_v2  ;;  %v1134_v7 = vadd.f32 %v1100_v5, %v978_v3 }
 0x3a2   : > { %1146 = vst [vmem:[%s2344_s23] sm:$0xff] %v1130_v6 }
 0x3a3   : > { %1150 = vst [vmem:[%s2344_s23 + $0x20] sm:$0xff] %v1134_v7 }
 0x3a6   : > { %v1110_v12 = vpop.f32.mrf.mxu2  ;;  %v1120_v13 = vpop.f32.mrf.mxu3 }
 0x3a7   : > { %v1138_v14 = vadd.f32 %v1110_v12, %v982_v8  ;;  %v1142_v15 = vadd.f32 %v1120_v13, %v986_v9  ;;  %v1092_v16 = vpop.f32.mrf.mxu0  ;;  %v1102_v17 = vpop.f32.mrf.mxu1 }
 0x3a8   : > { %v1131_v18 = vadd.f32 %v1092_v16, %v975_v10  ;;  %v1135_v19 = vadd.f32 %v1102_v17, %v979_v11 }
 0x3a9   : > { %1154 = vst [vmem:[%s2344_s23 + $0x40] sm:$0xff] %v1138_v14 }
 0x3aa   : > { %1158 = vst [vmem:[%s2344_s23 + $0x60] sm:$0xff] %v1142_v15 }
 0x3ab   : > { %1147 = vst [vmem:[%s2344_s23 + $0x8] sm:$0xff] %v1131_v18 }
 0x3ac   : > { %1151 = vst [vmem:[%s2344_s23 + $0x28] sm:$0xff] %v1135_v19 }
 0x3ae   : > { %v1112_v24 = vpop.f32.mrf.mxu2  ;;  %v1122_v25 = vpop.f32.mrf.mxu3 }
 0x3af   : > { %v1139_v26 = vadd.f32 %v1112_v24, %v983_v20  ;;  %v1143_v27 = vadd.f32 %v1122_v25, %v987_v21  ;;  %v1095_v28 = vpop.f32.mrf.mxu0  ;;  %v1105_v29 = vpop.f32.mrf.mxu1 }
 0x3b0   : > { %v1132_v30 = vadd.f32 %v1095_v28, %v976_v22  ;;  %v1136_v31 = vadd.f32 %v1105_v29, %v980_v23 }
 0x3b1   : > { %1155 = vst [vmem:[%s2344_s23 + $0x48] sm:$0xff] %v1139_v26 }
 0x3b2   : > { %1159 = vst [vmem:[%s2344_s23 + $0x68] sm:$0xff] %v1143_v27 }
 0x3b3   : > { %1148 = vst [vmem:[%s2344_s23 + $0x10] sm:$0xff] %v1132_v30 }
 0x3b4   : > { %1152 = vst [vmem:[%s2344_s23 + $0x30] sm:$0xff] %v1136_v31 }
 0x3b6   : > { %v1115_v36 = vpop.f32.mrf.mxu2  ;;  %v1125_v37 = vpop.f32.mrf.mxu3 }
 0x3b7   : > { %v1140_v38 = vadd.f32 %v1115_v36, %v984_v32  ;;  %v1144_v39 = vadd.f32 %v1125_v37, %v988_v33  ;;  %v1097_v40 = vpop.f32.mrf.mxu0  ;;  %v1107_v41 = vpop.f32.mrf.mxu1 }
 0x3b8   : > { %v1133_v42 = vadd.f32 %v1097_v40, %v977_v34  ;;  %v1137_v43 = vadd.f32 %v1107_v41, %v981_v35 }
 0x3b9   : > { %1156 = vst [vmem:[%s2344_s23 + $0x50] sm:$0xff] %v1140_v38 }
 0x3ba   : > { %1160 = vst [vmem:[%s2344_s23 + $0x70] sm:$0xff] %v1144_v39 }
 0x3bb   : > { %1149 = vst [vmem:[%s2344_s23 + $0x18] sm:$0xff] %v1133_v42 }
 0x3bc   : > { %1153 = vst [vmem:[%s2344_s23 + $0x38] sm:$0xff] %v1137_v43 }
 0x3be   : > { %v1117_v46 = vpop.f32.mrf.mxu2  ;;  %v1127_v47 = vpop.f32.mrf.mxu3 }
 0x3bf   : > { %v1141_v48 = vadd.f32 %v1117_v46, %v985_v44  ;;  %v1145_v49 = vadd.f32 %v1127_v47, %v989_v45 }
 0x3c1   : > { %1157 = vst [vmem:[%s2344_s23 + $0x58] sm:$0xff] %v1141_v48 }
 0x3c2   : > { %1161 = vst [vmem:[%s2344_s23 + $0x78] sm:$0xff] %v1145_v49 }
 0x3c3 PF: > { %s1569_s5 = sshll.u32 %s2060_s11, 7  ;;  %s2588_s10 = sld [smem:[#allocation32_spill]] }
 0x3c4   : > { %s1175_s14 = sshll.u32 %s2344_s23, 4  ;;  %s1163_s25 = scalar_lea.sflag [#allocation8], %s320_s26  ;;  %s1176_s14 = int_to_ptr.vmem [resolvable:$true] %s1175_s14 }
 0x3c9   : > { %s2589_s3 = smov %s2588_s10  ;;  %s1174_s12 = scalar_lea.hbm %s2588_s10, %s1569_s5 }
 0x3ca   : > { %s1177_s4 = sshll.u32 %s1174_s12, 4  ;;  %s1952_s11 = scalar_lea.hbm %s2589_s3, 256  ;;  %s1178_s4 = int_to_ptr.hbm [resolvable:$true] %s1177_s4 }
 0x3cb   : > { %s1946_s22 = sshra.s32 %s1178_s4, 4  ;;  %s1947_s22 = int_to_ptr.hbm [resolvable:$true] %s1946_s22 }
 0x3cc   : > { %s1948_s6 = scalar_lea.hbm %s1947_s22, 128  ;;  %p1953_p2 = scmp.lt.s32.totalorder %s1947_s22, %s2589_s3 }
 0x3cd   : > { %p1949_p3 = scmp.ne.s32.totalorder %s1947_s22, %s1948_s6  ;;  %p1954_p4 = scmp.lt.s32.totalorder %s1952_s11, %s1948_s6 }
 0x3cf   : > { %p1950_p11 = pnand %p1949_p3, %p2209_p7  ;;  %p1955_p5 = por %p1954_p4, %p1953_p2 }
 0x3d1   : > { %p1951_p0 = pneg %p1950_p11 }
 0x3d3   : > { %p1956_p6 = pnand %p1955_p5, %p1951_p0 }
 0x3d5   : > { %1959 = shalt.err (!%p1956_p6)
}
 0x3d6   : > { %s2086_s26 = smov 128   ;;  %s2087_s23 = smov 8  }
 0x3d7   : > { %1678 = dma.vmem_to_hbm [thread:$0]  (%p2209_p7), %s1176_s14, 2048, %s1178_s4, %s1163_s25, %s2086_s26, %s2086_s26, %s2087_s23  }
 0x3d8 PF: > { %s2590_s18 = sld [smem:[#allocation19_spill]]  ;;  %p1702_p8 = scmp.ge.s32.totalorder %s2076_s15, 2 }
 0x3da   : > { %p1694_p10 = pnand %p1702_p8, %p2214_p9 }
 0x3dc   : > { %p1695_p12 = pneg %p1694_p10 }
 0x3de   : > { %s1192_s24 = sand.u32 1, %s2590_s18  }
 0x3df   : > { %s1193_s5 = scalar_lea.sflag [#allocation8], %s1192_s24 }
 0x3e0   : > { %2023 = dma.done.wait (%p1695_p12), %s1193_s5, 2048  }
 0x3e1   : > { %2025 = vsyncadd (%p1695_p12), %s1193_s5, 4294965248  ;;  %s36_s15 = sadd.s32 1, %s2076_s15   ;;  %s2593_s16 = smov %s2296_s29 }
 0x3e2   : > { %p2483_p13 = scmp.ge.s32.totalorder %s36_s15, 22   ;;  %s2594_s9 = sld [smem:[#allocation22_spill]] }
 0x3e3   : > { %s2595_s11 = sld [smem:[#allocation23_spill]]  ;;  %s2599_s29 = smov %s2032_s0 }
 0x3e4   : > { %s2596_s12 = sld [smem:[#allocation26_spill]]  ;;  %s2600_s0 = smov %s2036_s30 }
 0x3e5   : > { %s2597_s20 = sld [smem:[#allocation27_spill]]  ;;  %s2601_s30 = smov %s2275_s1 }
 0x3e6   : > { %s2598_s14 = sld [smem:[#allocation28_spill]]  ;;  %s2602_s1 = smov %s2044_s7 }
 0x3e7   : > { %s2603_s7 = smov %s2048_s8  ;;  %s2604_s8 = smov %s2593_s16 }
 0x3e8   : > { %s2605_s10 = smov %s2068_s13  ;;  %35 = sbr.rel (!%p2483_p13) target bundleno = 21 (0x15), region = 112 }
 0x3eb   : > { %s2606_s13 = smov %s2597_s20 }
 0x3ed   :  { %1199 = vsyncpa [#allocation7], 1 }
 0x3ee   :  { %1201 = vsyncpa [#allocation7 + $0x1], 1 }
 0x3ef   :  { %1202 = vsyncpa [#allocation10], 1 }
 0x3f0   :  { %1203 = vsyncpa [#allocation8], 1 }
 0x3f1   :  { %1205 = vsyncpa [#allocation8 + $0x1], 1 }

</bundles_post_ra>
